<compile_context>
chip_gen: v5e
topology: v5e:2x2
jax: 0.10.0
libtpu: 0.0.40
codegen_flags: <defaults>
</compile_context>

<pallas_src>
import functools
import math

import numpy as np
import jax
import jax.numpy as jnp
from jax.experimental import pallas as pl
from jax.experimental.pallas import tpu as pltpu

_REF_PREC = jax.lax.Precision.HIGHEST


# ---------------------------------------------------------------------------
# hardware feature / limit detection (runs once, outside the forward pass)
# ---------------------------------------------------------------------------
@functools.lru_cache()
def _vmem_limit_bytes():
    # 3/4 of physical VMEM, capped at 96 MiB (v5e/v6e -> 96 MiB, v7x -> 48 MiB);
    # conservative 32 MiB fallback when the query is unavailable.
    try:
        cap = int(pltpu.get_tpu_info().vmem_capacity_bytes)
        return min(96 * 1024 * 1024, (cap * 3) // 4)
    except Exception:
        return 32 * 1024 * 1024


@functools.lru_cache()
def _int8_mxu(trans_rhs):
    """True if this chip lowers an int8 x int8 -> int32 MXU matmul (v5e/v6e)."""
    try:
        kind = jax.devices()[0].device_kind.lower()
    except Exception:
        kind = ""
    if "v7" in kind or "7x" in kind:
        return False                       # v7x MXU has no integer mode -> bf16
    dims = (((1,), (1,)) if trans_rhs else ((1,), (0,)), ((), ()))

    def probe(a_ref, b_ref, o_ref):
        o_ref[...] = jax.lax.dot_general(a_ref[...], b_ref[...], dims,
                                         preferred_element_type=jnp.int32)

    try:
        a = jnp.ones((128, 128), jnp.int8)
        out = pl.pallas_call(
            probe, out_shape=jax.ShapeDtypeStruct((128, 128), jnp.int32))(a, a)
        return bool(jnp.all(jax.block_until_ready(out) == 128))
    except Exception:
        return False


# ---------------------------------------------------------------------------
# small helpers
# ---------------------------------------------------------------------------
def _round_i8(x):
    return jnp.clip(jnp.round(x), -128.0, 127.0).astype(jnp.int8)


def _mm(a, b, dims, use_int8):
    if use_int8:
        # native integer MXU: exact int32 accumulation, half the operand VMEM
        return jax.lax.dot_general(a, b, (dims, ((), ())),
                                   preferred_element_type=jnp.int32)
    # single int8 -> bf16 cast (exact for int8 values); f32 accumulation
    return jax.lax.dot_general(a.astype(jnp.bfloat16), b.astype(jnp.bfloat16),
                               (dims, ((), ())),
                               preferred_element_type=jnp.float32)


def _mm_nn(a, b, use_int8):   # (M, K) @ (K, N)
    return _mm(a, b, ((1,), (0,)), use_int8)


def _mm_nt(a, b, use_int8):   # (M, K) @ (N, K)^T
    return _mm(a, b, ((1,), (1,)), use_int8)


def _fit(dim, target, align=1):
    """Largest tile <= target that divides `dim`, preferring multiples of `align`."""
    cap = min(dim, target)
    fallback = None
    for t in range(cap, 0, -1):
        if dim % t == 0:
            if fallback is None:
                fallback = t
            if t % align == 0:
                return t
    return fallback


# ---------------------------------------------------------------------------
# kernels
# ---------------------------------------------------------------------------
def _layernorm_q_kernel(x_ref, w_ref, o_ref, *, eps):
    x = x_ref[...]
    mean = jnp.mean(x, axis=-1, keepdims=True)
    xc = x - mean
    var = jnp.mean(xc * xc, axis=-1, keepdims=True)
    o_ref[...] = _round_i8(xc * jax.lax.rsqrt(var + eps) * w_ref[...])


def _lin_i8o8_kernel(x_ref, w_ref, a_ref, b_ref, o_ref, acc_ref, *, use_int8):
    # W8A8B8O8Linear (fused QKV): per-output-column alpha and (beta*bias) vectors.
    k = pl.program_id(2)

    @pl.when(k == 0)
    def _():
        acc_ref[...] = jnp.zeros_like(acc_ref)

    acc_ref[...] += _mm_nn(x_ref[...], w_ref[...], use_int8)

    @pl.when(k == pl.num_programs(2) - 1)
    def _():
        o_ref[...] = _round_i8(a_ref[...] * acc_ref[...].astype(jnp.float32)
                               + b_ref[...])


def _lin_f32_res_kernel(x_ref, w_ref, b_ref, res_ref, o_ref, acc_ref, *,
                        alpha, use_int8):
    # W8A8BFP32OFP32Linear fused with the decoder-layer residual add.
    k = pl.program_id(2)

    @pl.when(k == 0)
    def _():
        acc_ref[...] = jnp.zeros_like(acc_ref)

    acc_ref[...] += _mm_nn(x_ref[...], w_ref[...], use_int8)

    @pl.when(k == pl.num_programs(2) - 1)
    def _():
        o_ref[...] = res_ref[...] + alpha * acc_ref[...].astype(jnp.float32) \
            + b_ref[...]


def _mlp_gate_up_kernel(x_ref, wg_ref, bg_ref, wu_ref, bu_ref, o_ref,
                        accg_ref, accu_ref, *, alpha_gate, alpha_up,
                        inv_down_scale, use_int8):
    # gate_proj (SiLU) * up_proj, requantized to int8 for down_proj.
    k = pl.program_id(2)

    @pl.when(k == 0)
    def _():
        accg_ref[...] = jnp.zeros_like(accg_ref)
        accu_ref[...] = jnp.zeros_like(accu_ref)

    x = x_ref[...] if use_int8 else x_ref[...].astype(jnp.bfloat16)
    accg_ref[...] += _mm_nn(x, wg_ref[...], use_int8)
    accu_ref[...] += _mm_nn(x, wu_ref[...], use_int8)

    @pl.when(k == pl.num_programs(2) - 1)
    def _():
        g = alpha_gate * accg_ref[...].astype(jnp.float32) + bg_ref[...]
        g = g * pl.reciprocal(1.0 + jnp.exp(-g), approx=True)     # SiLU (EUP rcp)
        u = alpha_up * accu_ref[...].astype(jnp.float32) + bu_ref[...]
        o_ref[...] = _round_i8(g * u * inv_down_scale)


def _rope_kernel(q_ref, k_ref, v_ref, cos_ref, sin_ref, qo_ref, ko_ref, vo_ref, *,
                 half, q_in_scale, q_out_scale, k_in_scale, k_out_scale):
    # int8_rotary_embedding_fwd on q and k, plus head-major relayout of q/k/v.
    cosf = cos_ref[...]                         # (ts, Dh)  = [cos | cos]
    sins = sin_ref[...]                         # (ts, Dh)  = [-sin | sin]

    def rot(x_ref, in_s, out_s, o_ref):
        x = x_ref[...].astype(jnp.float32) * in_s
        # half-swap on the XLU; axis must be non-negative (x is (ts, Dh))
        xr = pltpu.roll(x, shift=half, axis=1)
        o_ref[...] = _round_i8((x * cosf + xr * sins) * (1.0 / out_s))

    rot(q_ref, q_in_scale, q_out_scale, qo_ref)
    rot(k_ref, k_in_scale, k_out_scale, ko_ref)
    vo_ref[...] = v_ref[...]                                 # pure int8 relayout


def _flash_attn_kernel(qt_ref, kt_ref, q_ref, k_ref, v_ref, o_ref,
                       m_ref, l_ref, acc_ref, *, scale, out_mult, use_int8):
    # triangular schedule: step -> (q-tile, kv-tile) with kv <= q only.
    step = pl.program_id(2)
    qi = qt_ref[step]
    ki = kt_ref[step]
    tq = q_ref.shape[0]
    tk = k_ref.shape[0]

    @pl.when(ki == 0)
    def _():
        m_ref[...] = jnp.full_like(m_ref, -1e30)
        l_ref[...] = jnp.zeros_like(l_ref)
        acc_ref[...] = jnp.zeros_like(acc_ref)

    def update(masked):
        s = _mm_nt(q_ref[...], k_ref[...], use_int8).astype(jnp.float32) * scale
        if masked:
            # diagonal tile only (tq == tk): local lower-triangular mask
            rows = jax.lax.broadcasted_iota(jnp.int32, (tq, tk), 0)
            cols = jax.lax.broadcasted_iota(jnp.int32, (tq, tk), 1)
            s = jnp.where(cols <= rows, s, -1e30)
        m_prev = m_ref[...]
        m_new = jnp.maximum(m_prev, jnp.max(s, axis=-1, keepdims=True))
        corr = jnp.exp(m_prev - m_new)
        p = jnp.exp(s - m_new)                               # unnormalized probs
        l_ref[...] = corr * l_ref[...] + jnp.sum(p, axis=-1, keepdims=True)
        acc_ref[...] = corr * acc_ref[...] + _mm_nn(p.astype(jnp.bfloat16),
                                                    v_ref[...], False)
        m_ref[...] = m_new

    @pl.when(ki < qi)          # fully-visible tile: no mask work on the VPU
    def _():
        update(masked=False)

    @pl.when(ki == qi)         # diagonal tile: mask + finalize (last kv of row)
    def _():
        update(masked=True)
        inv_l = pl.reciprocal(l_ref[...], approx=True)
        o_ref[...] = _round_i8(acc_ref[...] * (inv_l * out_mult))


# ---------------------------------------------------------------------------
# pallas_call wrappers
# ---------------------------------------------------------------------------
def layernorm_q(x, w, eps, *, tm=512):
    T, H = x.shape
    tm = _fit(T, tm, 8)
    return pl.pallas_call(
        functools.partial(_layernorm_q_kernel, eps=eps),
        grid=(T // tm,),
        in_specs=[pl.BlockSpec((tm, H), lambda i: (i, 0)),
                  pl.BlockSpec((1, H), lambda i: (0, 0))],
        out_specs=pl.BlockSpec((tm, H), lambda i: (i, 0)),
        out_shape=jax.ShapeDtypeStruct((T, H), jnp.int8),
        compiler_params=pltpu.CompilerParams(
            dimension_semantics=("parallel",),
            vmem_limit_bytes=_vmem_limit_bytes()),
    )(x, w.reshape(1, H))


def linear_i8o8(x, w_kn, alpha_row, bias_row, *, tm=512, tn=512, tk=1024):
    # W8A8B8O8Linear; weight already stored pre-transposed as (K, N).
    T, K = x.shape
    N = w_kn.shape[1]
    use_int8 = _int8_mxu(False)
    tm, tn, tk = _fit(T, tm, 8), _fit(N, tn, 128), _fit(K, tk, 128)
    return pl.pallas_call(
        functools.partial(_lin_i8o8_kernel, use_int8=use_int8),
        grid=(T // tm, N // tn, K // tk),
        in_specs=[pl.BlockSpec((tm, tk), lambda m, n, k: (m, k)),
                  pl.BlockSpec((tk, tn), lambda m, n, k: (k, n)),
                  pl.BlockSpec((1, tn), lambda m, n, k: (0, n)),
                  pl.BlockSpec((1, tn), lambda m, n, k: (0, n))],
        out_specs=pl.BlockSpec((tm, tn), lambda m, n, k: (m, n)),
        out_shape=jax.ShapeDtypeStruct((T, N), jnp.int8),
        scratch_shapes=[pltpu.VMEM((tm, tn),
                                   jnp.int32 if use_int8 else jnp.float32)],
        compiler_params=pltpu.CompilerParams(
            dimension_semantics=("parallel", "parallel", "arbitrary"),
            vmem_limit_bytes=_vmem_limit_bytes()),
        cost_estimate=pl.CostEstimate(flops=2 * T * N * K, transcendentals=0,
                                      bytes_accessed=T * K + K * N + T * N),
    )(x, w_kn, alpha_row, bias_row)


def linear_f32_res(x, w_kn, b_row, res, alpha, *, tm=512, tn=512, tk=1024):
    # W8A8BFP32OFP32Linear fused with the residual add; weight is (K, N).
    T, K = x.shape
    N = w_kn.shape[1]
    use_int8 = _int8_mxu(False)
    tm, tn, tk = _fit(T, tm, 8), _fit(N, tn, 128), _fit(K, tk, 128)
    return pl.pallas_call(
        functools.partial(_lin_f32_res_kernel, alpha=alpha, use_int8=use_int8),
        grid=(T // tm, N // tn, K // tk),
        in_specs=[pl.BlockSpec((tm, tk), lambda m, n, k: (m, k)),
                  pl.BlockSpec((tk, tn), lambda m, n, k: (k, n)),
                  pl.BlockSpec((1, tn), lambda m, n, k: (0, n)),
                  pl.BlockSpec((tm, tn), lambda m, n, k: (m, n))],
        out_specs=pl.BlockSpec((tm, tn), lambda m, n, k: (m, n)),
        out_shape=jax.ShapeDtypeStruct((T, N), jnp.float32),
        scratch_shapes=[pltpu.VMEM((tm, tn),
                                   jnp.int32 if use_int8 else jnp.float32)],
        compiler_params=pltpu.CompilerParams(
            dimension_semantics=("parallel", "parallel", "arbitrary"),
            vmem_limit_bytes=_vmem_limit_bytes()),
        cost_estimate=pl.CostEstimate(flops=2 * T * N * K, transcendentals=0,
                                      bytes_accessed=T * K + K * N + 8 * T * N),
    )(x, w_kn, b_row, res)


def mlp_gate_up(x, wg_kn, bg_row, wu_kn, bu_row, alpha_gate, alpha_up,
                down_scale, *, tm=512, tn=512, tk=1024):
    T, K = x.shape
    N = wg_kn.shape[1]
    use_int8 = _int8_mxu(False)
    tm, tn, tk = _fit(T, tm, 8), _fit(N, tn, 128), _fit(K, tk, 128)
    acc_dtype = jnp.int32 if use_int8 else jnp.float32
    return pl.pallas_call(
        functools.partial(_mlp_gate_up_kernel, alpha_gate=alpha_gate,
                          alpha_up=alpha_up, inv_down_scale=1.0 / down_scale,
                          use_int8=use_int8),
        grid=(T // tm, N // tn, K // tk),
        in_specs=[pl.BlockSpec((tm, tk), lambda m, n, k: (m, k)),
                  pl.BlockSpec((tk, tn), lambda m, n, k: (k, n)),
                  pl.BlockSpec((1, tn), lambda m, n, k: (0, n)),
                  pl.BlockSpec((tk, tn), lambda m, n, k: (k, n)),
                  pl.BlockSpec((1, tn), lambda m, n, k: (0, n))],
        out_specs=pl.BlockSpec((tm, tn), lambda m, n, k: (m, n)),
        out_shape=jax.ShapeDtypeStruct((T, N), jnp.int8),
        scratch_shapes=[pltpu.VMEM((tm, tn), acc_dtype),
                        pltpu.VMEM((tm, tn), acc_dtype)],
        compiler_params=pltpu.CompilerParams(
            dimension_semantics=("parallel", "parallel", "arbitrary"),
            vmem_limit_bytes=_vmem_limit_bytes()),
        cost_estimate=pl.CostEstimate(flops=4 * T * N * K, transcendentals=T * N,
                                      bytes_accessed=T * K + 2 * K * N + T * N),
    )(x, wg_kn, bg_row, wu_kn, bu_row)


def rope_and_split(qkv, cos_full, sin_signed, B, S, nH, Dh,
                   q_in, q_out, k_in, k_out, *, ts=512):
    # grid (batch, seq-tile, head): head innermost so the cos/sin block index is
    # constant across the inner loop -> tables DMA'd once per (b, seq-tile).
    ts = _fit(S, ts, 8)
    spb = S // ts
    half = Dh // 2
    i8 = jax.ShapeDtypeStruct((B, nH, S, Dh), jnp.int8)
    out_spec = pl.BlockSpec((None, None, ts, Dh), lambda b, st, h: (b, h, st, 0))
    cs_spec = pl.BlockSpec((ts, Dh), lambda b, st, h: (b * spb + st, 0))
    q_spec = pl.BlockSpec((ts, Dh), lambda b, st, h: (b * spb + st, h))
    k_spec = pl.BlockSpec((ts, Dh), lambda b, st, h: (b * spb + st, nH + h))
    v_spec = pl.BlockSpec((ts, Dh), lambda b, st, h: (b * spb + st, 2 * nH + h))
    return pl.pallas_call(
        functools.partial(_rope_kernel, half=half,
                          q_in_scale=q_in, q_out_scale=q_out,
                          k_in_scale=k_in, k_out_scale=k_out),
        grid=(B, spb, nH),
        in_specs=[q_spec, k_spec, v_spec, cs_spec, cs_spec],
        out_specs=[out_spec, out_spec, out_spec],
        out_shape=[i8, i8, i8],
        compiler_params=pltpu.CompilerParams(
            dimension_semantics=("parallel", "parallel", "arbitrary"),
            vmem_limit_bytes=_vmem_limit_bytes()),
    )(qkv, qkv, qkv, cos_full, sin_signed)


def flash_attention_i8(q, k, v, q_scale, k_scale, v_scale, out_scale, *, t=256):
    # flash-style causal attention over a triangular (q-tile, kv-tile) schedule.
    # Output is written token-major (B, S, H) so o_proj is a plain deep-K linear.
    B, nH, S, Dh = q.shape
    H = nH * Dh
    t = _fit(S, t, 8)                    # tq == tk keeps the diagonal on one tile
    n_t = S // t
    use_int8 = _int8_mxu(True)           # QK^T uses a transposed-RHS int8 matmul
    scale = q_scale * k_scale / math.sqrt(Dh)

    qi_list, ki_list = [], []
    for qi in range(n_t):
        for ki in range(qi + 1):         # causally-valid pairs only
            qi_list.append(qi)
            ki_list.append(ki)
    qi_tbl = jnp.asarray(qi_list, jnp.int32)
    ki_tbl = jnp.asarray(ki_list, jnp.int32)
    n_steps = len(qi_list)

    q_spec = pl.BlockSpec((None, None, t, Dh),
                          lambda b, h, s, qt, kt: (b, h, qt[s], 0))
    kv_spec = pl.BlockSpec((None, None, t, Dh),
                           lambda b, h, s, qt, kt: (b, h, kt[s], 0))
    o_spec = pl.BlockSpec((None, t, Dh),
                          lambda b, h, s, qt, kt: (b, qt[s], h))

    grid_spec = pltpu.PrefetchScalarGridSpec(
        num_scalar_prefetch=2,
        grid=(B, nH, n_steps),
        in_specs=[q_spec, kv_spec, kv_spec],
        out_specs=o_spec,
        scratch_shapes=[pltpu.VMEM((t, 1), jnp.float32),
                        pltpu.VMEM((t, 1), jnp.float32),
                        pltpu.VMEM((t, Dh), jnp.float32)])

    return pl.pallas_call(
        functools.partial(_flash_attn_kernel, scale=scale,
                          out_mult=v_scale / out_scale, use_int8=use_int8),
        grid_spec=grid_spec,
        out_shape=jax.ShapeDtypeStruct((B, S, H), jnp.int8),
        compiler_params=pltpu.CompilerParams(
            dimension_semantics=("parallel", "parallel", "arbitrary"),
            vmem_limit_bytes=_vmem_limit_bytes()),
    )(qi_tbl, ki_tbl, q, k, v)


# ---------------------------------------------------------------------------
# one-time (load-time) parameter preparation
# ---------------------------------------------------------------------------
def prepare_decoder_params(params, cfg):
    """Pre-transposed (K, N) int8 weights, fused QKV weight / alpha / beta*bias,
    and rotary tables.  Keeps all HBM reshuffling out of the forward pass."""
    H = params['wq'].shape[1]

    def row(v):
        return jnp.asarray(v, jnp.float32).reshape(1, -1)

    prep = {
        'ln1_w': jnp.asarray(params['ln1_w'], jnp.float32),
        'ln2_w': jnp.asarray(params['ln2_w'], jnp.float32),
        'wqkv_t': jnp.concatenate(
            [params['wq'], params['wk'], params['wv']], axis=0).T,   # (K, 3H)
        'qkv_alpha': jnp.concatenate([
            jnp.full((H,), cfg['q_alpha'], jnp.float32),
            jnp.full((H,), cfg['k_alpha'], jnp.float32),
            jnp.full((H,), cfg['v_alpha'], jnp.float32)]).reshape(1, -1),
        'qkv_bias': row(cfg['qkv_beta'] * jnp.concatenate(
            [params['bq'], params['bk'], params['bv']]).astype(jnp.float32)),
        'wo_t': params['wo'].T,
        'bo': row(params['bo']),
        'wg_t': params['wg'].T,
        'bg': row(params['bg']),
        'wu_t': params['wu'].T,
        'bu': row(params['bu']),
        'wd_t': params['wd'].T,
        'bd': row(params['bd']),
        # rotary tables: full head width, sign folded into sin (kept f32).
        # TODO(synk): store as bf16 to halve table DMA when drift vs f32 is OK.
        'cos_full': jnp.concatenate([params['rope_cos'], params['rope_cos']], -1),
        'sin_signed': jnp.concatenate([-params['rope_sin'], params['rope_sin']], -1),
    }
    return jax.tree_util.tree_map(jnp.asarray, prep)


# ---------------------------------------------------------------------------
# decoder layer forward
# ---------------------------------------------------------------------------
def llama_smoothquant_decoder_layer(hidden_states, prep, cfg):
    B, S, H = hidden_states.shape
    nH = cfg['num_heads']
    Dh = H // nH
    T = B * S
    x = hidden_states.reshape(T, H)

    # ------------- self-attention branch -------------
    residual = x
    ln1 = layernorm_q(x, prep['ln1_w'], cfg['rms_norm_eps'])

    # fused QKV projection (ln1 read once; per-column alpha / beta*bias)
    qkv = linear_i8o8(ln1, prep['wqkv_t'], prep['qkv_alpha'], prep['qkv_bias'])

    # rotary(q,k) + head-major relayout of q/k/v -> (B, nH, S, Dh) int8
    q_h, k_h, v_h = rope_and_split(
        qkv, prep['cos_full'], prep['sin_signed'], B, S, nH, Dh,
        cfg['q_output_scale'], cfg['q_rotary_output_scale'],
        cfg['k_output_scale'], cfg['k_rotary_output_scale'])

    # TODO(synk): kv-cache writeback (copy_kv_cache_to_dest / BatchInferState) and
    # decode-stage smooth_token_attention_fwd are omitted; this is the context path.
    attn = flash_attention_i8(q_h, k_h, v_h,
                              cfg['q_rotary_output_scale'],
                              cfg['k_rotary_output_scale'],
                              cfg['v_output_scale'], cfg['out_input_scale'])

    # o_proj: plain deep-K linear over the token-major attention output,
    # fused with the residual add.
    hs = linear_f32_res(attn.reshape(T, H), prep['wo_t'], prep['bo'],
                        residual, cfg['o_alpha'])

    # ------------- MLP branch -------------
    residual2 = hs
    ln2 = layernorm_q(hs, prep['ln2_w'], cfg['rms_norm_eps'])
    inter = mlp_gate_up(ln2, prep['wg_t'], prep['bg'], prep['wu_t'], prep['bu'],
                        cfg['gate_alpha'], cfg['up_alpha'], cfg['down_input_scale'])
    out = linear_f32_res(inter, prep['wd_t'], prep['bd'], residual2,
                         cfg['down_alpha'])
    return out.reshape(B, S, H)


# ---------------------------------------------------------------------------
# pure-JAX reference (same arithmetic) for correctness
# ---------------------------------------------------------------------------
def reference_layer(hidden_states, params, cfg):
    B, S, H = hidden_states.shape
    nH = cfg['num_heads']
    Dh = H // nH
    T = B * S
    x = hidden_states.reshape(T, H)

    def ln_q(y, w, eps):
        mean = jnp.mean(y, -1, keepdims=True)
        yc = y - mean
        var = jnp.mean(yc * yc, -1, keepdims=True)
        return _round_i8(yc * jax.lax.rsqrt(var + eps) * w[None, :])

    def dot_f32(a_i8, w_i8):
        return jnp.dot(a_i8.astype(jnp.float32), w_i8.astype(jnp.float32).T,
                       precision=_REF_PREC)

    residual = x
    ln1 = ln_q(x, params['ln1_w'], cfg['rms_norm_eps'])

    wqkv = jnp.concatenate([params['wq'], params['wk'], params['wv']], axis=0)
    alpha_vec = jnp.concatenate([
        jnp.full((H,), cfg['q_alpha'], jnp.float32),
        jnp.full((H,), cfg['k_alpha'], jnp.float32),
        jnp.full((H,), cfg['v_alpha'], jnp.float32)])
    bias_vec = cfg['qkv_beta'] * jnp.concatenate(
        [params['bq'], params['bk'], params['bv']]).astype(jnp.float32)
    qkv = _round_i8(alpha_vec[None, :] * dot_f32(ln1, wqkv) + bias_vec[None, :])

    q, k, v = qkv[:, :H], qkv[:, H:2 * H], qkv[:, 2 * H:]
    cos_full = jnp.concatenate([params['rope_cos'], params['rope_cos']], axis=-1)
    sin_signed = jnp.concatenate([-params['rope_sin'], params['rope_sin']], axis=-1)

    def rope(t_i8, in_s, out_s):
        tf = t_i8.reshape(T, nH, Dh).astype(jnp.float32) * in_s
        tr = jnp.roll(tf, Dh // 2, axis=-1)
        y = tf * cos_full[:, None, :] + tr * sin_signed[:, None, :]
        return _round_i8(y * (1.0 / out_s))

    q = rope(q, cfg['q_output_scale'], cfg['q_rotary_output_scale'])
    k = rope(k, cfg['k_output_scale'], cfg['k_rotary_output_scale'])
    v = v.reshape(T, nH, Dh)

    def heads(t):
        return t.reshape(B, S, nH, Dh).transpose(0, 2, 1, 3)

    qh, kh, vh = heads(q), heads(k), heads(v)
    scale = cfg['q_rotary_output_scale'] * cfg['k_rotary_output_scale'] / math.sqrt(Dh)
    out_mult = cfg['v_output_scale'] / cfg['out_input_scale']

    qb = qh.astype(jnp.float32).astype(jnp.bfloat16)
    kb = kh.astype(jnp.float32).astype(jnp.bfloat16)
    vb = vh.astype(jnp.float32).astype(jnp.bfloat16)
    s = jnp.einsum('bhqd,bhkd->bhqk', qb, kb,
                   preferred_element_type=jnp.float32) * scale
    mask = jnp.tril(jnp.ones((S, S), dtype=bool))
    s = jnp.where(mask[None, None], s, -1e30)
    m = jnp.max(s, axis=-1, keepdims=True)
    p = jnp.exp(s - m)
    l = jnp.sum(p, axis=-1, keepdims=True)
    acc = jnp.einsum('bhqk,bhkd->bhqd', p.astype(jnp.bfloat16), vb,
                     preferred_element_type=jnp.float32)
    attn = _round_i8(acc * ((1.0 / l) * out_mult))

    attn_flat = attn.transpose(0, 2, 1, 3).reshape(T, H)
    hs = residual + cfg['o_alpha'] * dot_f32(attn_flat, params['wo']) \
        + params['bo'][None, :]

    residual2 = hs
    ln2 = ln_q(hs, params['ln2_w'], cfg['rms_norm_eps'])
    g = cfg['gate_alpha'] * dot_f32(ln2, params['wg']) + params['bg'][None, :]
    g = g * (1.0 / (1.0 + jnp.exp(-g)))
    u = cfg['up_alpha'] * dot_f32(ln2, params['wu']) + params['bu'][None, :]
    inter = _round_i8(g * u * (1.0 / cfg['down_input_scale']))
    out = residual2 + cfg['down_alpha'] * dot_f32(inter, params['wd']) \
        + params['bd'][None, :]
    return out.reshape(B, S, H)


# ---------------------------------------------------------------------------
if __name__ == "__main__":
    B, S, H, nH, I = 2, 16, 256, 2, 512
    Dh = H // nH
    T = B * S

    keys = jax.random.split(jax.random.PRNGKey(0), 17)

    def rand_i8(k, shape):
        return jax.random.randint(k, shape, -127, 128, dtype=jnp.int32).astype(jnp.int8)

    params = {
        # LayerNormQ weights already folded with 1/output_scale (from_float semantics)
        'ln1_w': (1.0 + 0.05 * jax.random.normal(keys[0], (H,), jnp.float32)) / 0.025,
        'ln2_w': (1.0 + 0.05 * jax.random.normal(keys[1], (H,), jnp.float32)) / 0.025,
        'wq': rand_i8(keys[2], (H, H)),  'bq': rand_i8(keys[3], (H,)),
        'wk': rand_i8(keys[4], (H, H)),  'bk': rand_i8(keys[5], (H,)),
        'wv': rand_i8(keys[6], (H, H)),  'bv': rand_i8(keys[7], (H,)),
        'wo': rand_i8(keys[8], (H, H)),
        'bo': 0.01 * jax.random.normal(keys[9], (H,), jnp.float32),
        'wg': rand_i8(keys[10], (I, H)),
        'bg': 0.01 * jax.random.normal(keys[11], (I,), jnp.float32),
        'wu': rand_i8(keys[12], (I, H)),
        'bu': 0.01 * jax.random.normal(keys[13], (I,), jnp.float32),
        'wd': rand_i8(keys[14], (H, I)),
        'bd': 0.01 * jax.random.normal(keys[15], (H,), jnp.float32),
    }

    # scales chosen like a well-calibrated smoothquant checkpoint (int8
    # intermediates use most of the +-127 range without extreme saturation)
    cfg = dict(
        num_heads=nH, rms_norm_eps=1e-5,
        q_alpha=1e-3, k_alpha=1e-3, v_alpha=1e-3, qkv_beta=0.02,
        q_output_scale=0.02, k_output_scale=0.02, v_output_scale=0.02,
        q_rotary_output_scale=0.02, k_rotary_output_scale=0.02,
        out_input_scale=0.01, o_alpha=2e-5,
        gate_alpha=1e-3, up_alpha=1e-3,
        down_input_scale=50.0, down_alpha=2e-5,
    )

    # rotary tables per token (positions 0..S-1 within each batch element)
    pos = jnp.tile(jnp.arange(S, dtype=jnp.float32), B)                 # (T,)
    inv_freq = 1.0 / (10000.0 ** (jnp.arange(0, Dh, 2, dtype=jnp.float32) / Dh))
    freqs = pos[:, None] * inv_freq[None, :]                            # (T, Dh//2)
    params['rope_cos'] = jnp.cos(freqs)
    params['rope_sin'] = jnp.sin(freqs)

    hidden_states = jax.random.normal(keys[16], (B, S, H), jnp.float32)

    prep = prepare_decoder_params(params, cfg)                          # load-time
    out = llama_smoothquant_decoder_layer(hidden_states, prep, cfg)
    out = jax.block_until_ready(out)

    ref = reference_layer(hidden_states, params, cfg)
    np.testing.assert_allclose(np.asarray(out), np.asarray(ref), rtol=0.0, atol=1.0)

    print("KERNEL_OK")
</pallas_src>

<mosaic_0001>
module attributes {stable_mosaic.version = 11 : i64} {
  func.func @_layernorm_q_kernel(%arg0: i32, %arg1: memref<32x256xf32, #tpu.memory_space<vmem>>, %arg2: memref<1x256xf32, #tpu.memory_space<vmem>>, %arg3: memref<32x256xi8, #tpu.memory_space<vmem>>) attributes {dimension_semantics = [#tpu.dimension_semantics<parallel>], iteration_bounds = array<i64: 1>, scalar_prefetch = 0 : i64, scratch_operands = 0 : i64, tpu.core_type = #tpu.core_type<tc>, window_params = [{transform_indices = @transform_0, window_bounds = array<i64: 32, 256>}, {pipeline_mode = #tpu.pipeline_mode<synchronous>, transform_indices = @transform_1, window_bounds = array<i64: 1, 256>}, {transform_indices = @transform_2, window_bounds = array<i64: 32, 256>}]} {
    %c0 = arith.constant 0 : index
    %c0_0 = arith.constant 0 : index
    %0 = vector.load %arg1[%c0, %c0_0] : memref<32x256xf32, #tpu.memory_space<vmem>>, vector<32x256xf32>
    %cst = arith.constant dense<0.000000e+00> : vector<32xf32>
    %1 = vector.multi_reduction <add>, %0, %cst [1] : vector<32x256xf32> to vector<32xf32>
    %2 = vector.shape_cast %1 : vector<32xf32> to vector<32x1xf32>
    %cst_1 = arith.constant 2.560000e+02 : f32
    %3 = vector.broadcast %cst_1 : f32 to vector<32x1xf32>
    %4 = arith.divf %2, %3 : vector<32x1xf32>
    %5 = vector.broadcast %4 : vector<32x1xf32> to vector<32x256xf32>
    %6 = arith.subf %0, %5 : vector<32x256xf32>
    %7 = arith.mulf %6, %6 : vector<32x256xf32>
    %cst_2 = arith.constant dense<0.000000e+00> : vector<32xf32>
    %8 = vector.multi_reduction <add>, %7, %cst_2 [1] : vector<32x256xf32> to vector<32xf32>
    %9 = vector.shape_cast %8 : vector<32xf32> to vector<32x1xf32>
    %cst_3 = arith.constant 2.560000e+02 : f32
    %10 = vector.broadcast %cst_3 : f32 to vector<32x1xf32>
    %11 = arith.divf %9, %10 : vector<32x1xf32>
    %cst_4 = arith.constant 9.99999974E-6 : f32
    %12 = vector.broadcast %cst_4 : f32 to vector<32x1xf32>
    %13 = arith.addf %11, %12 : vector<32x1xf32>
    %14 = math.rsqrt %13 : vector<32x1xf32>
    %15 = vector.broadcast %14 : vector<32x1xf32> to vector<32x256xf32>
    %16 = arith.mulf %6, %15 : vector<32x256xf32>
    %c0_5 = arith.constant 0 : index
    %c0_6 = arith.constant 0 : index
    %17 = vector.load %arg2[%c0_5, %c0_6] : memref<1x256xf32, #tpu.memory_space<vmem>>, vector<1x256xf32>
    %18 = vector.broadcast %17 : vector<1x256xf32> to vector<32x256xf32>
    %19 = arith.mulf %16, %18 : vector<32x256xf32>
    %20 = math.roundeven %19 : vector<32x256xf32>
    %cst_7 = arith.constant -1.280000e+02 : f32
    %cst_8 = arith.constant 1.270000e+02 : f32
    %21 = vector.broadcast %cst_7 : f32 to vector<32x256xf32>
    %22 = arith.maximumf %21, %20 : vector<32x256xf32>
    %23 = vector.broadcast %cst_8 : f32 to vector<32x256xf32>
    %24 = arith.minimumf %23, %22 : vector<32x256xf32>
    %25 = arith.fptosi %24 : vector<32x256xf32> to vector<32x256xi8>
    %c0_9 = arith.constant 0 : index
    %c0_10 = arith.constant 0 : index
    %26 = vector.load %arg3[%c0_9, %c0_10] : memref<32x256xi8, #tpu.memory_space<vmem>>, vector<32x256xi8>
    tpu.vector_store %arg3[%c0_9, %c0_10], %25 {strides = array<i32>} : memref<32x256xi8, #tpu.memory_space<vmem>>, vector<32x256xi8>,
    return
  }
  func.func @transform_0(%arg0: i32) -> (i32, i32) {
    %c0_i32 = arith.constant 0 : i32
    %c0_i32_0 = arith.constant 0 : i32
    return %arg0, %c0_i32 : i32, i32
  }
  func.func @transform_1(%arg0: i32) -> (i32, i32) {
    %c0_i32 = arith.constant 0 : i32
    %c0_i32_0 = arith.constant 0 : i32
    %c0_i32_1 = arith.constant 0 : i32
    return %c0_i32, %c0_i32_0 : i32, i32
  }
  func.func @transform_2(%arg0: i32) -> (i32, i32) {
    %c0_i32 = arith.constant 0 : i32
    %c0_i32_0 = arith.constant 0 : i32
    return %arg0, %c0_i32 : i32, i32
  }
}

</mosaic_0001>

<bundles_post_ra>
// kernel: tpu_custom_call.1
= control target key start
LH: loop header
LB: loop body
LE: loop exit
PB: predicated region body
PF: predicated region fallthrough
CT: control target
= control target key end

     0   :  { %7 = vsyncpa [#allocation3], 0  ;;  %s473_s0 = inlined_call_operand.hbm [shape: f32[32,256], index: 0, kind: input, shape index: {}]   ;;  %s474_s1 = inlined_call_operand.hbm [shape: f32[1,256], index: 1, kind: input, shape index: {}]   ;;  %s475_s2 = inlined_call_operand.hbm [shape: s8[32,256], index: 2, kind: output, shape index: {}]  }
   0x1   :  { %8 = vsyncpa [#allocation6], 0 }
   0x2   :  { %9 = vsyncpa [#allocation4], 0  ;;  %s14_s11 = sshll.u32 %s473_s0, 4  ;;  %s403_s12 = smov [#allocation2]   ;;  %s15_s11 = int_to_ptr.hbm [resolvable:$true] %s14_s11 }
   0x3   :  { %s16_s13 = sshll.u32 %s403_s12, 4  ;;  %s28_s16 = sshll.u32 %s474_s1, 4  ;;  %s17_s13 = int_to_ptr.vmem [resolvable:$true] %s16_s13  ;;  %s29_s16 = int_to_ptr.hbm [resolvable:$true] %s28_s16 }
   0x4   :  { %s404_s17 = smov 256   ;;  %s405_s18 = smov 16  }
   0x5   :  { %22 = dma.hbm_to_vmem [thread:$0]  %s15_s11, 1024, %s17_s13, [#allocation3], %s404_s17, %s404_s17, %s405_s18  }
   0x6   :  { %s406_s19 = smov [#allocation5]  }
   0x7   :  { %s30_s20 = sshll.u32 %s406_s19, 4  ;;  %s31_s20 = int_to_ptr.vmem [resolvable:$true] %s30_s20 }
   0x8   :  { %33 = dma.hbm_to_vmem [thread:$0]  %s29_s16, 32, %s31_s20, [#allocation6]  }
   0x9   :  { %397 = dma.done.wait [#allocation3], 1024  }
   0xa   :  { %398 = vsyncadd [#allocation3], 4294966272 }
   0xb   :  { %399 = dma.done.wait [#allocation6], 32  }
   0xc   :  { %400 = vsyncadd [#allocation6], 4294967264  ;;  %v46_v0 = vld [vmem:[#allocation2 + $0x20] sm:$0xff]  ;;  %v47_v1 = vld [vmem:[#allocation2 + $0x28] sm:$0xff]  ;;  %v407_v12 = vmov 256.0   ;;  %s408_s0 = smov [#allocation7]  }
   0xd   :  { %v42_v2 = vld [vmem:[#allocation2] sm:$0xff]  ;;  %v56_v3 = vadd.f32 %v47_v1, %v46_v0  ;;  %v43_v4 = vld [vmem:[#allocation2 + $0x8] sm:$0xff]  ;;  %v48_v6 = vld [vmem:[#allocation2 + $0x30] sm:$0xff]  ;;  %315 = vrcp.f32 %v407_v12  ;;  %s232_s1 = sshll.u32 %s408_s0, 4  ;;  %s234_s23 = sshll.u32 %s475_s2, 4  ;;  %s233_s1 = int_to_ptr.vmem [resolvable:$true] %s232_s1  ;;  %s235_s23 = int_to_ptr.hbm [resolvable:$true] %s234_s23 }
   0xe   :  { %v50_v5 = vadd.f32 %v43_v4, %v42_v2  ;;  %v49_v7 = vld [vmem:[#allocation2 + $0x38] sm:$0xff]  ;;  %v44_v8 = vld [vmem:[#allocation2 + $0x10] sm:$0xff] }
   0xf   :  { %57 = vadd.xlane.f32.xlu1 %v56_v3  ;;  %v45_v9 = vld [vmem:[#allocation2 + $0x18] sm:$0xff]  ;;  %v59_v10 = vadd.f32 %v49_v7, %v48_v6 }
  0x10   :  { %51 = vadd.xlane.f32.xlu0 %v50_v5  ;;  %v53_v11 = vadd.f32 %v45_v9, %v44_v8  ;;  %v157_v5 = vld [vmem:[#allocation5] sm:$0x3] }
  0x11   :  { %v159_v12 = vperm.slane %v157_v5, 0 }
  0x13   :  { %v316_v13 = vpop.eup %315 }
  0x14   :  { %v63_v14 = vmul.f32 256.0, %v316_v13  ;;  %vm67_vm0 = vweird.f32 %v316_v13 }
  0x16   :  { %v64_v15 = vsub.f32 1.0, %v63_v14 }
  0x17   :  { %60 = vadd.xlane.f32.xlu1 %v59_v10 }
  0x18   :  { %54 = vadd.xlane.f32.xlu0 %v53_v11  ;;  %v65_v16 = vmul.f32 %v316_v13, %v64_v15 }
  0x1a   :  { %v66_v17 = vadd.f32 %v316_v13, %v65_v16 }
  0x1c   :  { %v68_v18 = vsel %vm67_vm0, %v316_v13, %v66_v17  ;;  %v160_v13 = vperm.slane %v157_v5, 1 }
  0x82   :  { %v58_v19 = vpop.xlane.xlu1 %57 }
  0x83   :  { %v71_v20 = vmul.f32 %v68_v18, %v58_v19  ;;  %v52_v21 = vpop.xlane.xlu0 %51 }
  0x84   :  { %v69_v22 = vmul.f32 %v68_v18, %v52_v21 }
  0x85   :  { %v430_v23 = vsub.f32 %v46_v0, %v71_v20  ;;  %v432_v24 = vsub.f32 %v47_v1, %v71_v20 }
  0x86   :  { %v434_v25 = vsub.f32 %v42_v2, %v69_v22  ;;  %v436_v26 = vsub.f32 %v43_v4, %v69_v22 }
  0x87   :  { %v85_v27 = vmul.f32 %v430_v23, %v430_v23  ;;  %v86_v28 = vmul.f32 %v432_v24, %v432_v24 }
  0x88   :  { %v81_v29 = vmul.f32 %v434_v25, %v434_v25  ;;  %v82_v30 = vmul.f32 %v436_v26, %v436_v26 }
  0x89   :  { %v95_v31 = vadd.f32 %v86_v28, %v85_v27 }
  0x8a   :  { %v61_v32 = vpop.xlane.xlu1 %60  ;;  %v89_v33 = vadd.f32 %v82_v30, %v81_v29 }
  0x8b   :  { %v72_v34 = vmul.f32 %v68_v18, %v61_v32  ;;  %v55_v35 = vpop.xlane.xlu0 %54  ;;  %96 = vadd.xlane.f32.xlu0 %v95_v31 }
  0x8c   :  { %v70_v36 = vmul.f32 %v68_v18, %v55_v35  ;;  %90 = vadd.xlane.f32.xlu2 %v89_v33 }
  0x8d   :  { %v446_v37 = vsub.f32 %v48_v6, %v72_v34  ;;  %v448_v38 = vsub.f32 %v49_v7, %v72_v34 }
  0x8e   :  { %v450_v39 = vsub.f32 %v44_v8, %v70_v36  ;;  %v452_v40 = vsub.f32 %v45_v9, %v70_v36 }
  0x8f   :  { %v87_v41 = vmul.f32 %v446_v37, %v446_v37  ;;  %v88_v42 = vmul.f32 %v448_v38, %v448_v38 }
  0x90   :  { %v83_v43 = vmul.f32 %v450_v39, %v450_v39  ;;  %v84_v44 = vmul.f32 %v452_v40, %v452_v40 }
  0x91   :  { %v98_v45 = vadd.f32 %v88_v42, %v87_v41 }
  0x92   :  { %v92_v46 = vadd.f32 %v84_v44, %v83_v43 }
  0x93   :  { %99 = vadd.xlane.f32.xlu1 %v98_v45 }
  0x94   :  { %93 = vadd.xlane.f32.xlu2 %v92_v46 }
  0xfe   :  { %v97_v47 = vpop.xlane.xlu0 %96 }
  0xff   :  { %v91_v48 = vpop.xlane.xlu2 %90  ;;  %v103_v49 = vmul.f32 %v97_v47, %v68_v18 }
 0x100   :  { %v101_v50 = vmul.f32 %v91_v48, %v68_v18 }
 0x101   :  { %v107_v51 = vadd.f32 1e-05, %v103_v49 }
 0x102   :  { %v105_v52 = vadd.f32 1e-05, %v101_v50 }
 0x103   :  { %317 = vrsqrt.f32 %v107_v51  ;;  %vm135_vm3 = vweird.f32 %v107_v51 }
 0x104   :  { %319 = vrsqrt.f32 %v105_v52  ;;  %vm115_vm4 = vweird.f32 %v105_v52 }
 0x106   :  { %v100_v53 = vpop.xlane.xlu1 %99 }
 0x107   :  { %v104_v54 = vmul.f32 %v100_v53, %v68_v18  ;;  %v94_v55 = vpop.xlane.xlu2 %93 }
 0x108   :  { %v102_v56 = vmul.f32 %v94_v55, %v68_v18 }
 0x109   :  { %v318_v57 = vpop.eup %317  ;;  %v108_v58 = vadd.f32 1e-05, %v104_v54 }
 0x10a   :  { %v320_v59 = vpop.eup %319  ;;  %v130_v60 = vmul.f32 %v318_v57, %v107_v51  ;;  %v106_v61 = vadd.f32 1e-05, %v102_v56  ;;  %vm136_vm1 = vweird.f32 %v318_v57 }
 0x10b   :  { %v110_v62 = vmul.f32 %v320_v59, %v105_v52  ;;  %321 = vrsqrt.f32 %v108_v58  ;;  %vm116_vm2 = vweird.f32 %v320_v59  ;;  %vm137_vm5 = vmor %vm135_vm3, %vm136_vm1  ;;  %vm145_vm9 = vweird.f32 %v108_v58 }
 0x10c   :  { %v131_v63 = vmul.f32 %v318_v57, %v130_v60  ;;  %323 = vrsqrt.f32 %v106_v61  ;;  %vm117_vm6 = vmor %vm115_vm4, %vm116_vm2  ;;  %vm125_vm11 = vweird.f32 %v106_v61 }
 0x10d   :  { %v111_v0 = vmul.f32 %v320_v59, %v110_v62 }
 0x10e   :  { %v132_v1 = vmul.f32 0.5, %v131_v63 }
 0x10f   :  { %v112_v2 = vmul.f32 0.5, %v111_v0 }
 0x110   :  { %v133_v3 = vsub.f32 1.5, %v132_v1 }
 0x111   :  { %v322_v4 = vpop.eup %321  ;;  %v113_v6 = vsub.f32 1.5, %v112_v2 }
 0x112   :  { %v324_v7 = vpop.eup %323  ;;  %v134_v8 = vmul.f32 %v318_v57, %v133_v3  ;;  %v140_v9 = vmul.f32 %v322_v4, %v108_v58  ;;  %vm146_vm7 = vweird.f32 %v322_v4 }
 0x113   :  { %v114_v10 = vmul.f32 %v320_v59, %v113_v6  ;;  %v120_v11 = vmul.f32 %v324_v7, %v106_v61  ;;  %vm126_vm8 = vweird.f32 %v324_v7  ;;  %vm147_vm10 = vmor %vm145_vm9, %vm146_vm7 }
 0x114   :  { %v138_v14 = vsel %vm137_vm5, %v318_v57, %v134_v8  ;;  %v141_v15 = vmul.f32 %v322_v4, %v140_v9  ;;  %vm127_vm12 = vmor %vm125_vm11, %vm126_vm8 }
 0x115   :  { %v118_v16 = vsel %vm117_vm6, %v320_v59, %v114_v10  ;;  %v153_v17 = vmul.f32 %v138_v14, %v430_v23  ;;  %v154_v18 = vmul.f32 %v138_v14, %v432_v24  ;;  %v121_v19 = vmul.f32 %v324_v7, %v120_v11 }
 0x116   :  { %v149_v20 = vmul.f32 %v118_v16, %v434_v25  ;;  %v150_v21 = vmul.f32 %v118_v16, %v436_v26  ;;  %v142_v22 = vmul.f32 0.5, %v141_v15 }
 0x117   :  { %v122_v27 = vmul.f32 0.5, %v121_v19  ;;  %v167_v28 = vmul.f32 %v159_v12, %v153_v17  ;;  %v168_v30 = vmul.f32 %v160_v13, %v154_v18 }
 0x118   :  { %v143_v29 = vsub.f32 1.5, %v142_v22  ;;  %v163_v32 = vmul.f32 %v159_v12, %v149_v20  ;;  %v164_v33 = vmul.f32 %v160_v13, %v150_v21 }
 0x119   :  { %v123_v31 = vsub.f32 1.5, %v122_v27  ;;  %v273_v24 = vmax.f32 %v167_v28, -128.0  ;;  %v276_v25 = vmax.f32 %v168_v30, -128.0 }
 0x11a   :  { %v144_v34 = vmul.f32 %v322_v4, %v143_v29  ;;  %v261_v42 = vmax.f32 %v163_v32, -128.0  ;;  %v264_v43 = vmax.f32 %v164_v33, -128.0 }
 0x11b   :  { %v124_v23 = vmul.f32 %v324_v7, %v123_v31  ;;  %v274_v52 = vmin.f32 %v273_v24, 127.0  ;;  %v277_v53 = vmin.f32 %v276_v25, 127.0 }
 0x11c   :  { %v148_v35 = vsel %vm147_vm10, %v322_v4, %v144_v34  ;;  %v265_v56 = vmin.f32 %v264_v43, 127.0 }
 0x11d   :  { %v155_v26 = vmul.f32 %v148_v35, %v446_v37  ;;  %v156_v36 = vmul.f32 %v148_v35, %v448_v38  ;;  %v128_v41 = vsel %vm127_vm12, %v324_v7, %v124_v23  ;;  %v262_v37 = vmin.f32 %v261_v42, 127.0 }
 0x11e   :  { %v151_v44 = vmul.f32 %v128_v41, %v450_v39  ;;  %v152_v45 = vmul.f32 %v128_v41, %v452_v40  ;;  %v299_v60 = vcvt.f32.s32 %v274_v52  ;;  %v302_v39 = vcvt.f32.s32 %v277_v53 }
 0x11f   :  { %v169_v46 = vmul.f32 %v159_v12, %v155_v26  ;;  %v170_v47 = vmul.f32 %v160_v13, %v156_v36  ;;  %v287_v62 = vcvt.f32.s32 %v262_v37  ;;  %v290_v63 = vcvt.f32.s32 %v265_v56 }
 0x120   :  { %v165_v48 = vmul.f32 %v159_v12, %v151_v44  ;;  %v166_v49 = vmul.f32 %v160_v13, %v152_v45 }
 0x121   :  { %v279_v50 = vmax.f32 %v169_v46, -128.0  ;;  %v282_v51 = vmax.f32 %v170_v47, -128.0 }
 0x122   :  { %v267_v54 = vmax.f32 %v165_v48, -128.0  ;;  %v270_v55 = vmax.f32 %v166_v49, -128.0 }
 0x123   :  { %v280_v38 = vmin.f32 %v279_v50, 127.0  ;;  %v283_v57 = vmin.f32 %v282_v51, 127.0 }
 0x124   :  { %v268_v58 = vmin.f32 %v267_v54, 127.0  ;;  %v271_v59 = vmin.f32 %v270_v55, 127.0 }
 0x125   :  { %v305_v61 = vcvt.f32.s32 %v280_v38  ;;  %v308_v40 = vcvt.f32.s32 %v283_v57 }
 0x126   :  { %v293_v0 = vcvt.f32.s32 %v268_v58  ;;  %v296_v1 = vcvt.f32.s32 %v271_v59 }
 0x127   :  { %v220_v2 = vpack.c.b16 %v305_v61, %v299_v60  ;;  %v223_v3 = vpack.c.b16 %v308_v40, %v302_v39 }
 0x128   :  { %v219_v4 = vpack.c.b16 %v293_v0, %v287_v62  ;;  %v222_v5 = vpack.c.b16 %v296_v1, %v290_v63 }
 0x12a   :  { %v221_v6 = vpack.c.b8 %v220_v2, %v219_v4  ;;  %v224_v7 = vpack.c.b8 %v223_v3, %v222_v5 }
 0x12c   :  { %225 = vst [vmem:[#allocation7] sm:$0xff] %v221_v6 }
 0x12d   :  { %226 = vst [vmem:[#allocation7 + $0x8] sm:$0xff] %v224_v7 }
 0x12e   :  { %237 = dma.vmem_to_hbm [thread:$0]  %s233_s1, 256, %s235_s23, [#allocation4]  }
 0x12f   :  { %401 = dma.done.wait [#allocation4], 256  }
 0x130   :  { %402 = vsyncadd [#allocation4], 4294967040 }
 0x131   :  { %242 = vsyncpa [#allocation3], 1 }
 0x132   :  { %243 = vsyncpa [#allocation6], 1 }
 0x133   :  { %244 = vsyncpa [#allocation4], 1 }

</bundles_post_ra>
